<compile_context>
chip_gen: v7x
topology: tpu7x:2x2x1
jax: 0.10.0
libtpu: 0.0.40
codegen_flags: <defaults>
</compile_context>

<pallas_src>
import jax
import jax.numpy as jnp
from jax.experimental import pallas as pl
from jax.experimental.pallas import tpu as pltpu

LAYER_DIMS = [(300, 50), (50, 25), (25, 16), (16, 8), (8, 2)]
N_LAYERS = len(LAYER_DIMS)
IN_FEATURES = 300
PAD_F = 128          # lane-padded feature width used inside the kernel
BN_EPS = 1e-5
TILE_B_MAX = 512     # batch rows streamed per grid step for layer 0


def _encoder_kernel(n_ref, x_ref, w0_ref, wr_ref, gb_ref, o_ref, s1_ref):
    """Streamed layer 0 + fused (Linear -> identity -> BatchNorm1d) x5.

    n_ref : (1,) i32 SMEM       number of valid batch rows (scalar prefetch)
    x_ref : (TILE_B, 300)       current batch tile of the flattened input
    w0_ref: (300, 128)          layer-0 weight, zero-padded to 128 lanes
    wr_ref: (4, 128, 128)       layers 1-4 weights, zero-padded
    gb_ref: (10, 128)           rows 0..4 gamma, rows 5..9 beta (0 in pad lanes)
    o_ref : (Bp, 128)           resident output slab (also the layer-0 buffer)
    s1_ref: (1, 128) VMEM       streamed partial sum for BatchNorm #0
    """
    t = pl.program_id(0)
    n_tiles = pl.num_programs(0)
    tile_b = x_ref.shape[0]
    bp = o_ref.shape[0]
    cd = w0_ref.dtype            # matmul compute dtype (f32, or bf16 if packed so)

    # ---- Layer 0, streamed: the BlockSpec pipeline overlaps the next x-tile
    # DMA with this matmul. ----
    h0 = jnp.dot(x_ref[...], w0_ref[...], preferred_element_type=jnp.float32)
    row0 = pl.multiple_of(t * tile_b, 8)
    o_ref[pl.ds(row0, tile_b), :] = h0        # o_ref doubles as the resident slab

    # Partial BN-0 mean statistic.  Zero-padded rows contribute exactly 0
    # (x padded with zeros and the Linear bias is dropped), so no mask needed.
    @pl.when(t == 0)
    def _():
        s1_ref[...] = jnp.zeros_like(s1_ref)
    s1_ref[...] += jnp.sum(h0, axis=0, keepdims=True)

    # ---- Last tile: finish BN-0, then run layers 1..4 on the resident slab. ----
    @pl.when(t == n_tiles - 1)
    def _():
        n = n_ref[0]
        inv_n = 1.0 / n.astype(jnp.float32)
        # Always-masked stats -> n_valid is pure runtime data (no recompiles).
        row = jax.lax.broadcasted_iota(jnp.int32, (bp, 1), 0)
        mask = (row < n).astype(jnp.float32)

        # BatchNorm1d #0: mean from streamed partial sums, two-pass variance
        # on the resident activations (avoids E[x^2]-mean^2 cancellation).
        h = o_ref[...]
        mean = s1_ref[...] * inv_n
        d = (h - mean) * mask
        var = jnp.sum(d * d, axis=0, keepdims=True) * inv_n
        scale = gb_ref[0:1, :] * jax.lax.rsqrt(var + BN_EPS)     # EUP rsqrt
        h = d * scale + gb_ref[N_LAYERS:N_LAYERS + 1, :]

        # Layers 1..4: Linear (bias cancelled by BN), identity LeakyReLU,
        # fused training-mode BatchNorm1d (two-pass stats, f32).
        for i in range(1, N_LAYERS):
            h = jnp.dot(h.astype(cd), wr_ref[i - 1],
                        preferred_element_type=jnp.float32)      # (Bp,128)@(128,128)
            mean = jnp.sum(h * mask, axis=0, keepdims=True) * inv_n
            d = (h - mean) * mask
            var = jnp.sum(d * d, axis=0, keepdims=True) * inv_n
            scale = gb_ref[i:i + 1, :] * jax.lax.rsqrt(var + BN_EPS)
            h = d * scale + gb_ref[N_LAYERS + i:N_LAYERS + i + 1, :]

        # Lane-dense (Bp,128) store (unmasked vst); wrapper slices [:, :2].
        o_ref[...] = h


def init_params(key):
    """PyTorch-default-style init.  Bias is kept for the reference; the kernel
    drops it (cancelled by BatchNorm)."""
    params = []
    for fan_in, fan_out in LAYER_DIMS:
        key, k_w, k_b = jax.random.split(key, 3)
        bound = 1.0 / float(fan_in) ** 0.5
        w = jax.random.uniform(k_w, (fan_in, fan_out), jnp.float32, -bound, bound)
        b = jax.random.uniform(k_b, (1, fan_out), jnp.float32, -bound, bound)
        gamma = jnp.ones((1, fan_out), jnp.float32)
        beta = jnp.zeros((1, fan_out), jnp.float32)
        params.append((w, b, gamma, beta))
    return params


def pack_params(params, dtype=jnp.float32):
    """Pack parameters once, outside the per-call hot path.

    dtype=jnp.bfloat16 enables the (accuracy-affecting) bf16 matmul path on
    MXU-bound chips; BN stats/normalize stay in f32 inside the kernel.
    """
    w0 = jnp.zeros((IN_FEATURES, PAD_F), dtype)
    wr = jnp.zeros((N_LAYERS - 1, PAD_F, PAD_F), dtype)
    gb = jnp.zeros((2 * N_LAYERS, PAD_F), jnp.float32)
    for i, (w, _b, gamma, beta) in enumerate(params):
        fi, fo = LAYER_DIMS[i]
        if i == 0:
            w0 = w0.at[:fi, :fo].set(w.astype(dtype))
        else:
            wr = wr.at[i - 1, :fi, :fo].set(w.astype(dtype))
        gb = gb.at[i, :fo].set(gamma.reshape(-1))
        gb = gb.at[N_LAYERS + i, :fo].set(beta.reshape(-1))
    return w0, wr, gb


def _vmem_limit_bytes(bp, tile_b, x_itemsize):
    w_bytes = (304 * PAD_F + (N_LAYERS - 1) * PAD_F * PAD_F
               + 2 * N_LAYERS * PAD_F) * 4
    est = (2 * tile_b * 384 * x_itemsize   # double-buffered x tiles (300 -> 384 lanes)
           + w_bytes                       # resident weights + gamma/beta
           + bp * PAD_F * 4                # resident (Bp,128) output/activation slab
           + 3 * bp * PAD_F * 4            # live f32 temporaries in the finalize step
           + 8 * PAD_F * 4)                # stat scratch
    try:
        cap = int(0.75 * pltpu.get_tpu_info().vmem_capacity_bytes)
    except Exception:
        cap = 48 * 1024 * 1024             # safe for v7x's 64 MiB physical VMEM
    return int(min(max(16 * 1024 * 1024, 2 * est), cap))


def _round_up(x, m):
    return ((x + m - 1) // m) * m


@jax.jit
def encoder_forward_packed(x, w0, wr, gb):
    """x: (B, 3, 10, 10) -> (B, 2) float32, using pre-packed parameters."""
    B = x.shape[0]
    x2 = x.reshape(B, IN_FEATURES).astype(w0.dtype)     # x.view(-1, 300)
    bp8 = _round_up(B, 8)
    tile_b = min(TILE_B_MAX, bp8)
    n_tiles = -(-bp8 // tile_b)
    bp = n_tiles * tile_b
    if bp != B:
        x2 = jnp.pad(x2, ((0, bp - B), (0, 0)))
    n_arr = jnp.full((1,), B, jnp.int32)                 # runtime n_valid (SMEM)

    grid_spec = pltpu.PrefetchScalarGridSpec(
        num_scalar_prefetch=1,
        grid=(n_tiles,),
        in_specs=[
            pl.BlockSpec((tile_b, IN_FEATURES), lambda t, n: (t, 0)),          # x tile
            pl.BlockSpec((IN_FEATURES, PAD_F), lambda t, n: (0, 0)),           # w0 (resident)
            pl.BlockSpec((N_LAYERS - 1, PAD_F, PAD_F), lambda t, n: (0, 0, 0)),# w1..4
            pl.BlockSpec((2 * N_LAYERS, PAD_F), lambda t, n: (0, 0)),          # gamma/beta
        ],
        out_specs=pl.BlockSpec((bp, PAD_F), lambda t, n: (0, 0)),              # resident
        scratch_shapes=[pltpu.VMEM((1, PAD_F), jnp.float32)],                  # BN-0 sum
    )
    out = pl.pallas_call(
        _encoder_kernel,
        out_shape=jax.ShapeDtypeStruct((bp, PAD_F), jnp.float32),
        grid_spec=grid_spec,
        compiler_params=pltpu.CompilerParams(
            dimension_semantics=("arbitrary",),   # stats/output carried across tiles
            vmem_limit_bytes=_vmem_limit_bytes(
                bp, tile_b, jnp.dtype(w0.dtype).itemsize)),
    )(n_arr, x2, w0, wr, gb)
    return out[:B, :2]


def encoder_forward_ref(x, params):
    """Pure-JAX reference faithful to the PyTorch module (bias applied;
    LeakyReLU(negative_slope=1.0) is the identity; training-mode BN)."""
    B = x.shape[0]
    h = x.reshape(B, IN_FEATURES).astype(jnp.float32)
    for (w, b, gamma, beta) in params:
        h = h @ w + b
        mean = jnp.mean(h, axis=0, keepdims=True)
        var = jnp.mean((h - mean) ** 2, axis=0, keepdims=True)
        h = (h - mean) / jnp.sqrt(var + BN_EPS)
        h = h * gamma + beta
    return h


if __name__ == "__main__":
    key = jax.random.PRNGKey(0)
    k_x, k_p = jax.random.split(key)
    params = init_params(k_p)
    w0, wr, gb = pack_params(params)     # packed ONCE, outside the hot path

    # Main check: small batch, single tile, multiple of 8 sublanes.
    B = 8
    x = jax.random.normal(k_x, (B, 3, 10, 10), dtype=jnp.float32)
    out = jax.block_until_ready(encoder_forward_packed(x, w0, wr, gb))
    ref = encoder_forward_ref(x, params)
    assert out.shape == (B, 2), out.shape
    assert jnp.allclose(out, ref, atol=1e-4, rtol=1e-4), (
        f"max abs err {float(jnp.max(jnp.abs(out - ref)))}")

    # Non-multiple-of-8 batch exercises the masked-stats (runtime n_valid) path.
    B2 = 6
    x2 = jax.random.normal(jax.random.PRNGKey(1), (B2, 3, 10, 10), dtype=jnp.float32)
    out2 = jax.block_until_ready(encoder_forward_packed(x2, w0, wr, gb))
    ref2 = encoder_forward_ref(x2, params)
    assert out2.shape == (B2, 2), out2.shape
    assert jnp.allclose(out2, ref2, atol=1e-4, rtol=1e-4), (
        f"max abs err {float(jnp.max(jnp.abs(out2 - ref2)))}")

    # Multi-tile batch exercises the streamed layer-0 path (2 tiles of 512).
    B3 = 1000
    x3 = jax.random.normal(jax.random.PRNGKey(2), (B3, 3, 10, 10), dtype=jnp.float32)
    out3 = jax.block_until_ready(encoder_forward_packed(x3, w0, wr, gb))
    ref3 = encoder_forward_ref(x3, params)
    assert out3.shape == (B3, 2), out3.shape
    assert jnp.allclose(out3, ref3, atol=5e-4, rtol=5e-4), (
        f"max abs err {float(jnp.max(jnp.abs(out3 - ref3)))}")

    print("KERNEL_OK")
</pallas_src>

<mosaic_0001>
module attributes {stable_mosaic.version = 11 : i64} {
  func.func @_encoder_kernel(%arg0: i32, %arg1: memref<1xi32, #tpu.memory_space<smem>>, %arg2: memref<8x300xf32, #tpu.memory_space<vmem>>, %arg3: memref<300x128xf32, #tpu.memory_space<vmem>>, %arg4: memref<4x128x128xf32, #tpu.memory_space<vmem>>, %arg5: memref<10x128xf32, #tpu.memory_space<vmem>>, %arg6: memref<8x128xf32, #tpu.memory_space<vmem>>, %arg7: memref<1x128xf32, #tpu.memory_space<vmem>>) attributes {dimension_semantics = [#tpu.dimension_semantics<arbitrary>], iteration_bounds = array<i64: 1>, scalar_prefetch = 1 : i64, scratch_operands = 1 : i64, tpu.core_type = #tpu.core_type<tc>, window_params = [{transform_indices = @transform_0, window_bounds = array<i64: 8, 300>}, {pipeline_mode = #tpu.pipeline_mode<synchronous>, transform_indices = @transform_1, window_bounds = array<i64: 300, 128>}, {pipeline_mode = #tpu.pipeline_mode<synchronous>, transform_indices = @transform_2, window_bounds = array<i64: 4, 128, 128>}, {pipeline_mode = #tpu.pipeline_mode<synchronous>, transform_indices = @transform_3, window_bounds = array<i64: 10, 128>}, {pipeline_mode = #tpu.pipeline_mode<synchronous>, transform_indices = @transform_4, window_bounds = array<i64: 8, 128>}]} {
    %c0 = arith.constant 0 : index
    %c0_0 = arith.constant 0 : index
    %0 = vector.load %arg2[%c0, %c0_0] : memref<8x300xf32, #tpu.memory_space<vmem>>, vector<8x300xf32>
    %c0_1 = arith.constant 0 : index
    %c0_2 = arith.constant 0 : index
    %1 = vector.load %arg3[%c0_1, %c0_2] : memref<300x128xf32, #tpu.memory_space<vmem>>, vector<300x128xf32>
    %cst = arith.constant dense<0.000000e+00> : vector<8x128xf32>
    %2 = tpu.matmul %0, %1, %cst {dimension_numbers = #tpu.dot_dimension_numbers<[1], [0], [0], [1], [0, 0, 1, 1], [], []>} : vector<8x300xf32>, vector<300x128xf32>, vector<8x128xf32> -> vector<8x128xf32>
    %c8_i32 = arith.constant 8 : i32
    %3 = arith.muli %arg0, %c8_i32 : i32
    %4 = tpu.assume_multiple %3, 8 : i32
    %5 = arith.index_cast %4 : i32 to index
    %c0_3 = arith.constant 0 : index
    %6 = vector.load %arg6[%5, %c0_3] : memref<8x128xf32, #tpu.memory_space<vmem>>, vector<8x128xf32>
    tpu.vector_store %arg6[%5, %c0_3], %2 {strides = array<i32>} : memref<8x128xf32, #tpu.memory_space<vmem>>, vector<8x128xf32>,
    %c0_i32 = arith.constant 0 : i32
    %7 = arith.cmpi eq, %arg0, %c0_i32 : i32
    %8 = arith.extui %7 : i1 to i32
    %c0_i32_4 = arith.constant 0 : i32
    %9 = arith.cmpi ne, %8, %c0_i32_4 : i32
    scf.if %9 {
      %cst_12 = arith.constant 0.000000e+00 : f32
      %18 = vector.broadcast %cst_12 : f32 to vector<1x128xf32>
      %c0_13 = arith.constant 0 : index
      %c0_14 = arith.constant 0 : index
      %19 = vector.load %arg7[%c0_13, %c0_14] : memref<1x128xf32, #tpu.memory_space<vmem>>, vector<1x128xf32>
      tpu.vector_store %arg7[%c0_13, %c0_14], %18 {strides = array<i32>} : memref<1x128xf32, #tpu.memory_space<vmem>>, vector<1x128xf32>,
    } else {
    }
    %c0_5 = arith.constant 0 : index
    %c0_6 = arith.constant 0 : index
    %10 = vector.load %arg7[%c0_5, %c0_6] : memref<1x128xf32, #tpu.memory_space<vmem>>, vector<1x128xf32>
    %cst_7 = arith.constant dense<0.000000e+00> : vector<128xf32>
    %11 = vector.multi_reduction <add>, %2, %cst_7 [0] : vector<8x128xf32> to vector<128xf32>
    %12 = vector.shape_cast %11 : vector<128xf32> to vector<1x128xf32>
    %13 = arith.addf %10, %12 : vector<1x128xf32>
    %c0_8 = arith.constant 0 : index
    %c0_9 = arith.constant 0 : index
    %14 = vector.load %arg7[%c0_8, %c0_9] : memref<1x128xf32, #tpu.memory_space<vmem>>, vector<1x128xf32>
    tpu.vector_store %arg7[%c0_8, %c0_9], %13 {strides = array<i32>} : memref<1x128xf32, #tpu.memory_space<vmem>>, vector<1x128xf32>,
    %c0_i32_10 = arith.constant 0 : i32
    %15 = arith.cmpi eq, %arg0, %c0_i32_10 : i32
    %16 = arith.extui %15 : i1 to i32
    %c0_i32_11 = arith.constant 0 : i32
    %17 = arith.cmpi ne, %16, %c0_i32_11 : i32
    scf.if %17 {
      %c0_12 = arith.constant 0 : index
      %18 = memref.load %arg1[%c0_12] : memref<1xi32, #tpu.memory_space<smem>>
      %19 = arith.sitofp %18 : i32 to f32
      %cst_13 = arith.constant 1.000000e+00 : f32
      %20 = arith.divf %cst_13, %19 : f32
      %21 = tpu.iota {dimensions = array<i32: 0>} : vector<8x1xi32>
      %22 = vector.broadcast %18 : i32 to vector<8x1xi32>
      %23 = arith.cmpi slt, %21, %22 : vector<8x1xi32>
      %24 = arith.extui %23 : vector<8x1xi1> to vector<8x1xi32>
      %25 = arith.sitofp %24 : vector<8x1xi32> to vector<8x1xf32>
      %c0_14 = arith.constant 0 : index
      %c0_15 = arith.constant 0 : index
      %26 = vector.load %arg6[%c0_14, %c0_15] : memref<8x128xf32, #tpu.memory_space<vmem>>, vector<8x128xf32>
      %c0_16 = arith.constant 0 : index
      %c0_17 = arith.constant 0 : index
      %27 = vector.load %arg7[%c0_16, %c0_17] : memref<1x128xf32, #tpu.memory_space<vmem>>, vector<1x128xf32>
      %28 = vector.broadcast %20 : f32 to vector<1x128xf32>
      %29 = arith.mulf %27, %28 : vector<1x128xf32>
      %30 = vector.broadcast %29 : vector<1x128xf32> to vector<8x128xf32>
      %31 = arith.subf %26, %30 : vector<8x128xf32>
      %32 = vector.broadcast %25 : vector<8x1xf32> to vector<8x128xf32>
      %33 = arith.mulf %31, %32 : vector<8x128xf32>
      %34 = arith.mulf %33, %33 : vector<8x128xf32>
      %cst_18 = arith.constant dense<0.000000e+00> : vector<128xf32>
      %35 = vector.multi_reduction <add>, %34, %cst_18 [0] : vector<8x128xf32> to vector<128xf32>
      %36 = vector.shape_cast %35 : vector<128xf32> to vector<1x128xf32>
      %37 = vector.broadcast %20 : f32 to vector<1x128xf32>
      %38 = arith.mulf %36, %37 : vector<1x128xf32>
      %c0_19 = arith.constant 0 : index
      %c0_20 = arith.constant 0 : index
      %39 = vector.load %arg5[%c0_19, %c0_20] : memref<10x128xf32, #tpu.memory_space<vmem>>, vector<1x128xf32>
      %cst_21 = arith.constant 9.99999974E-6 : f32
      %40 = vector.broadcast %cst_21 : f32 to vector<1x128xf32>
      %41 = arith.addf %38, %40 : vector<1x128xf32>
      %42 = math.rsqrt %41 : vector<1x128xf32>
      %43 = arith.mulf %39, %42 : vector<1x128xf32>
      %44 = vector.broadcast %43 : vector<1x128xf32> to vector<8x128xf32>
      %45 = arith.mulf %33, %44 : vector<8x128xf32>
      %c5 = arith.constant 5 : index
      %c0_22 = arith.constant 0 : index
      %46 = vector.load %arg5[%c5, %c0_22] : memref<10x128xf32, #tpu.memory_space<vmem>>, vector<1x128xf32>
      %47 = vector.broadcast %46 : vector<1x128xf32> to vector<8x128xf32>
      %48 = arith.addf %45, %47 : vector<8x128xf32>
      %c0_23 = arith.constant 0 : index
      %c0_24 = arith.constant 0 : index
      %c0_25 = arith.constant 0 : index
      %49 = vector.load %arg4[%c0_23, %c0_24, %c0_25] : memref<4x128x128xf32, #tpu.memory_space<vmem>>, vector<1x128x128xf32>
      %50 = vector.shape_cast %49 : vector<1x128x128xf32> to vector<128x128xf32>
      %cst_26 = arith.constant dense<0.000000e+00> : vector<8x128xf32>
      %51 = tpu.matmul %48, %50, %cst_26 {dimension_numbers = #tpu.dot_dimension_numbers<[1], [0], [0], [1], [0, 0, 1, 1], [], []>} : vector<8x128xf32>, vector<128x128xf32>, vector<8x128xf32> -> vector<8x128xf32>
      %52 = vector.broadcast %25 : vector<8x1xf32> to vector<8x128xf32>
      %53 = arith.mulf %51, %52 : vector<8x128xf32>
      %cst_27 = arith.constant dense<0.000000e+00> : vector<128xf32>
      %54 = vector.multi_reduction <add>, %53, %cst_27 [0] : vector<8x128xf32> to vector<128xf32>
      %55 = vector.shape_cast %54 : vector<128xf32> to vector<1x128xf32>
      %56 = vector.broadcast %20 : f32 to vector<1x128xf32>
      %57 = arith.mulf %55, %56 : vector<1x128xf32>
      %58 = vector.broadcast %57 : vector<1x128xf32> to vector<8x128xf32>
      %59 = arith.subf %51, %58 : vector<8x128xf32>
      %60 = vector.broadcast %25 : vector<8x1xf32> to vector<8x128xf32>
      %61 = arith.mulf %59, %60 : vector<8x128xf32>
      %62 = arith.mulf %61, %61 : vector<8x128xf32>
      %cst_28 = arith.constant dense<0.000000e+00> : vector<128xf32>
      %63 = vector.multi_reduction <add>, %62, %cst_28 [0] : vector<8x128xf32> to vector<128xf32>
      %64 = vector.shape_cast %63 : vector<128xf32> to vector<1x128xf32>
      %65 = vector.broadcast %20 : f32 to vector<1x128xf32>
      %66 = arith.mulf %64, %65 : vector<1x128xf32>
      %c1 = arith.constant 1 : index
      %c0_29 = arith.constant 0 : index
      %67 = vector.load %arg5[%c1, %c0_29] : memref<10x128xf32, #tpu.memory_space<vmem>>, vector<1x128xf32>
      %cst_30 = arith.constant 9.99999974E-6 : f32
      %68 = vector.broadcast %cst_30 : f32 to vector<1x128xf32>
      %69 = arith.addf %66, %68 : vector<1x128xf32>
      %70 = math.rsqrt %69 : vector<1x128xf32>
      %71 = arith.mulf %67, %70 : vector<1x128xf32>
      %72 = vector.broadcast %71 : vector<1x128xf32> to vector<8x128xf32>
      %73 = arith.mulf %61, %72 : vector<8x128xf32>
      %c6 = arith.constant 6 : index
      %c0_31 = arith.constant 0 : index
      %74 = vector.load %arg5[%c6, %c0_31] : memref<10x128xf32, #tpu.memory_space<vmem>>, vector<1x128xf32>
      %75 = vector.broadcast %74 : vector<1x128xf32> to vector<8x128xf32>
      %76 = arith.addf %73, %75 : vector<8x128xf32>
      %c1_32 = arith.constant 1 : index
      %c0_33 = arith.constant 0 : index
      %c0_34 = arith.constant 0 : index
      %77 = vector.load %arg4[%c1_32, %c0_33, %c0_34] : memref<4x128x128xf32, #tpu.memory_space<vmem>>, vector<1x128x128xf32>
      %78 = vector.shape_cast %77 : vector<1x128x128xf32> to vector<128x128xf32>
      %cst_35 = arith.constant dense<0.000000e+00> : vector<8x128xf32>
      %79 = tpu.matmul %76, %78, %cst_35 {dimension_numbers = #tpu.dot_dimension_numbers<[1], [0], [0], [1], [0, 0, 1, 1], [], []>} : vector<8x128xf32>, vector<128x128xf32>, vector<8x128xf32> -> vector<8x128xf32>
      %80 = vector.broadcast %25 : vector<8x1xf32> to vector<8x128xf32>
      %81 = arith.mulf %79, %80 : vector<8x128xf32>
      %cst_36 = arith.constant dense<0.000000e+00> : vector<128xf32>
      %82 = vector.multi_reduction <add>, %81, %cst_36 [0] : vector<8x128xf32> to vector<128xf32>
      %83 = vector.shape_cast %82 : vector<128xf32> to vector<1x128xf32>
      %84 = vector.broadcast %20 : f32 to vector<1x128xf32>
      %85 = arith.mulf %83, %84 : vector<1x128xf32>
      %86 = vector.broadcast %85 : vector<1x128xf32> to vector<8x128xf32>
      %87 = arith.subf %79, %86 : vector<8x128xf32>
      %88 = vector.broadcast %25 : vector<8x1xf32> to vector<8x128xf32>
      %89 = arith.mulf %87, %88 : vector<8x128xf32>
      %90 = arith.mulf %89, %89 : vector<8x128xf32>
      %cst_37 = arith.constant dense<0.000000e+00> : vector<128xf32>
      %91 = vector.multi_reduction <add>, %90, %cst_37 [0] : vector<8x128xf32> to vector<128xf32>
      %92 = vector.shape_cast %91 : vector<128xf32> to vector<1x128xf32>
      %93 = vector.broadcast %20 : f32 to vector<1x128xf32>
      %94 = arith.mulf %92, %93 : vector<1x128xf32>
      %c2 = arith.constant 2 : index
      %c0_38 = arith.constant 0 : index
      %95 = vector.load %arg5[%c2, %c0_38] : memref<10x128xf32, #tpu.memory_space<vmem>>, vector<1x128xf32>
      %cst_39 = arith.constant 9.99999974E-6 : f32
      %96 = vector.broadcast %cst_39 : f32 to vector<1x128xf32>
      %97 = arith.addf %94, %96 : vector<1x128xf32>
      %98 = math.rsqrt %97 : vector<1x128xf32>
      %99 = arith.mulf %95, %98 : vector<1x128xf32>
      %100 = vector.broadcast %99 : vector<1x128xf32> to vector<8x128xf32>
      %101 = arith.mulf %89, %100 : vector<8x128xf32>
      %c7 = arith.constant 7 : index
      %c0_40 = arith.constant 0 : index
      %102 = vector.load %arg5[%c7, %c0_40] : memref<10x128xf32, #tpu.memory_space<vmem>>, vector<1x128xf32>
      %103 = vector.broadcast %102 : vector<1x128xf32> to vector<8x128xf32>
      %104 = arith.addf %101, %103 : vector<8x128xf32>
      %c2_41 = arith.constant 2 : index
      %c0_42 = arith.constant 0 : index
      %c0_43 = arith.constant 0 : index
      %105 = vector.load %arg4[%c2_41, %c0_42, %c0_43] : memref<4x128x128xf32, #tpu.memory_space<vmem>>, vector<1x128x128xf32>
      %106 = vector.shape_cast %105 : vector<1x128x128xf32> to vector<128x128xf32>
      %cst_44 = arith.constant dense<0.000000e+00> : vector<8x128xf32>
      %107 = tpu.matmul %104, %106, %cst_44 {dimension_numbers = #tpu.dot_dimension_numbers<[1], [0], [0], [1], [0, 0, 1, 1], [], []>} : vector<8x128xf32>, vector<128x128xf32>, vector<8x128xf32> -> vector<8x128xf32>
      %108 = vector.broadcast %25 : vector<8x1xf32> to vector<8x128xf32>
      %109 = arith.mulf %107, %108 : vector<8x128xf32>
      %cst_45 = arith.constant dense<0.000000e+00> : vector<128xf32>
      %110 = vector.multi_reduction <add>, %109, %cst_45 [0] : vector<8x128xf32> to vector<128xf32>
      %111 = vector.shape_cast %110 : vector<128xf32> to vector<1x128xf32>
      %112 = vector.broadcast %20 : f32 to vector<1x128xf32>
      %113 = arith.mulf %111, %112 : vector<1x128xf32>
      %114 = vector.broadcast %113 : vector<1x128xf32> to vector<8x128xf32>
      %115 = arith.subf %107, %114 : vector<8x128xf32>
      %116 = vector.broadcast %25 : vector<8x1xf32> to vector<8x128xf32>
      %117 = arith.mulf %115, %116 : vector<8x128xf32>
      %118 = arith.mulf %117, %117 : vector<8x128xf32>
      %cst_46 = arith.constant dense<0.000000e+00> : vector<128xf32>
      %119 = vector.multi_reduction <add>, %118, %cst_46 [0] : vector<8x128xf32> to vector<128xf32>
      %120 = vector.shape_cast %119 : vector<128xf32> to vector<1x128xf32>
      %121 = vector.broadcast %20 : f32 to vector<1x128xf32>
      %122 = arith.mulf %120, %121 : vector<1x128xf32>
      %c3 = arith.constant 3 : index
      %c0_47 = arith.constant 0 : index
      %123 = vector.load %arg5[%c3, %c0_47] : memref<10x128xf32, #tpu.memory_space<vmem>>, vector<1x128xf32>
      %cst_48 = arith.constant 9.99999974E-6 : f32
      %124 = vector.broadcast %cst_48 : f32 to vector<1x128xf32>
      %125 = arith.addf %122, %124 : vector<1x128xf32>
      %126 = math.rsqrt %125 : vector<1x128xf32>
      %127 = arith.mulf %123, %126 : vector<1x128xf32>
      %128 = vector.broadcast %127 : vector<1x128xf32> to vector<8x128xf32>
      %129 = arith.mulf %117, %128 : vector<8x128xf32>
      %c8 = arith.constant 8 : index
      %c0_49 = arith.constant 0 : index
      %130 = vector.load %arg5[%c8, %c0_49] : memref<10x128xf32, #tpu.memory_space<vmem>>, vector<1x128xf32>
      %131 = vector.broadcast %130 : vector<1x128xf32> to vector<8x128xf32>
      %132 = arith.addf %129, %131 : vector<8x128xf32>
      %c3_50 = arith.constant 3 : index
      %c0_51 = arith.constant 0 : index
      %c0_52 = arith.constant 0 : index
      %133 = vector.load %arg4[%c3_50, %c0_51, %c0_52] : memref<4x128x128xf32, #tpu.memory_space<vmem>>, vector<1x128x128xf32>
      %134 = vector.shape_cast %133 : vector<1x128x128xf32> to vector<128x128xf32>
      %cst_53 = arith.constant dense<0.000000e+00> : vector<8x128xf32>
      %135 = tpu.matmul %132, %134, %cst_53 {dimension_numbers = #tpu.dot_dimension_numbers<[1], [0], [0], [1], [0, 0, 1, 1], [], []>} : vector<8x128xf32>, vector<128x128xf32>, vector<8x128xf32> -> vector<8x128xf32>
      %136 = vector.broadcast %25 : vector<8x1xf32> to vector<8x128xf32>
      %137 = arith.mulf %135, %136 : vector<8x128xf32>
      %cst_54 = arith.constant dense<0.000000e+00> : vector<128xf32>
      %138 = vector.multi_reduction <add>, %137, %cst_54 [0] : vector<8x128xf32> to vector<128xf32>
      %139 = vector.shape_cast %138 : vector<128xf32> to vector<1x128xf32>
      %140 = vector.broadcast %20 : f32 to vector<1x128xf32>
      %141 = arith.mulf %139, %140 : vector<1x128xf32>
      %142 = vector.broadcast %141 : vector<1x128xf32> to vector<8x128xf32>
      %143 = arith.subf %135, %142 : vector<8x128xf32>
      %144 = vector.broadcast %25 : vector<8x1xf32> to vector<8x128xf32>
      %145 = arith.mulf %143, %144 : vector<8x128xf32>
      %146 = arith.mulf %145, %145 : vector<8x128xf32>
      %cst_55 = arith.constant dense<0.000000e+00> : vector<128xf32>
      %147 = vector.multi_reduction <add>, %146, %cst_55 [0] : vector<8x128xf32> to vector<128xf32>
      %148 = vector.shape_cast %147 : vector<128xf32> to vector<1x128xf32>
      %149 = vector.broadcast %20 : f32 to vector<1x128xf32>
      %150 = arith.mulf %148, %149 : vector<1x128xf32>
      %c4 = arith.constant 4 : index
      %c0_56 = arith.constant 0 : index
      %151 = vector.load %arg5[%c4, %c0_56] : memref<10x128xf32, #tpu.memory_space<vmem>>, vector<1x128xf32>
      %cst_57 = arith.constant 9.99999974E-6 : f32
      %152 = vector.broadcast %cst_57 : f32 to vector<1x128xf32>
      %153 = arith.addf %150, %152 : vector<1x128xf32>
      %154 = math.rsqrt %153 : vector<1x128xf32>
      %155 = arith.mulf %151, %154 : vector<1x128xf32>
      %156 = vector.broadcast %155 : vector<1x128xf32> to vector<8x128xf32>
      %157 = arith.mulf %145, %156 : vector<8x128xf32>
      %c9 = arith.constant 9 : index
      %c0_58 = arith.constant 0 : index
      %158 = vector.load %arg5[%c9, %c0_58] : memref<10x128xf32, #tpu.memory_space<vmem>>, vector<1x128xf32>
      %159 = vector.broadcast %158 : vector<1x128xf32> to vector<8x128xf32>
      %160 = arith.addf %157, %159 : vector<8x128xf32>
      %c0_59 = arith.constant 0 : index
      %c0_60 = arith.constant 0 : index
      %161 = vector.load %arg6[%c0_59, %c0_60] : memref<8x128xf32, #tpu.memory_space<vmem>>, vector<8x128xf32>
      tpu.vector_store %arg6[%c0_59, %c0_60], %160 {strides = array<i32>} : memref<8x128xf32, #tpu.memory_space<vmem>>, vector<8x128xf32>,
    } else {
    }
    return
  }
  func.func @transform_0(%arg0: i32, %arg1: memref<1xi32, #tpu.memory_space<smem>>) -> (i32, i32) {
    %c0_i32 = arith.constant 0 : i32
    %c0_i32_0 = arith.constant 0 : i32
    return %arg0, %c0_i32 : i32, i32
  }
  func.func @transform_1(%arg0: i32, %arg1: memref<1xi32, #tpu.memory_space<smem>>) -> (i32, i32) {
    %c0_i32 = arith.constant 0 : i32
    %c0_i32_0 = arith.constant 0 : i32
    %c0_i32_1 = arith.constant 0 : i32
    return %c0_i32, %c0_i32_0 : i32, i32
  }
  func.func @transform_2(%arg0: i32, %arg1: memref<1xi32, #tpu.memory_space<smem>>) -> (i32, i32, i32) {
    %c0_i32 = arith.constant 0 : i32
    %c0_i32_0 = arith.constant 0 : i32
    %c0_i32_1 = arith.constant 0 : i32
    %c0_i32_2 = arith.constant 0 : i32
    return %c0_i32, %c0_i32_0, %c0_i32_1 : i32, i32, i32
  }
  func.func @transform_3(%arg0: i32, %arg1: memref<1xi32, #tpu.memory_space<smem>>) -> (i32, i32) {
    %c0_i32 = arith.constant 0 : i32
    %c0_i32_0 = arith.constant 0 : i32
    %c0_i32_1 = arith.constant 0 : i32
    return %c0_i32, %c0_i32_0 : i32, i32
  }
  func.func @transform_4(%arg0: i32, %arg1: memref<1xi32, #tpu.memory_space<smem>>) -> (i32, i32) {
    %c0_i32 = arith.constant 0 : i32
    %c0_i32_0 = arith.constant 0 : i32
    %c0_i32_1 = arith.constant 0 : i32
    return %c0_i32, %c0_i32_0 : i32, i32
  }
}

</mosaic_0001>

<bundles_post_ra>
// kernel: encoder_forward_packed.1
= control target key start
LH: loop header
LB: loop body
LE: loop exit
PB: predicated region body
PF: predicated region fallthrough
CT: control target
= control target key end

     0   :  { %v1235_v3 = vmov 0.0|0.0   ;;  %vm1236_vm0 = vmmov 0   ;;  %v1237_v8 = vmov 0.0   ;;  %vm64_vm1 = vcmask 1043456   ;;  %s1701_s2 = inlined_call_operand.vmem [shape: f32[300,128], index: 2, kind: input, shape index: {}]   ;;  %s1702_s0 = inlined_call_operand.<no memory space> [shape: s32[1], index: 0, kind: input, shape index: {}]   ;;  %s1703_s1 = inlined_call_operand.vmem [shape: f32[8,300], index: 1, kind: input, shape index: {}]   ;;  %s1704_s3 = inlined_call_operand.vmem [shape: f32[4,128,128], index: 3, kind: input, shape index: {}]   ;;  %s1705_s4 = inlined_call_operand.vmem [shape: f32[10,128], index: 4, kind: input, shape index: {}]   ;;  %s1706_s5 = inlined_call_operand.vmem [shape: f32[8,128], index: 5, kind: output, shape index: {}]  }
   0x1   :  { %v38_v0 = vld [vmem:[%s1701_s2 + $0x80] sm:$0xff]  ;;  %v39_v1 = vld [vmem:[%s1701_s2 + $0x88] sm:$0xff]  ;;  %1111 = vmatprep.subr.bf16.mxu1 %v1235_v3  ;;  %s229_s26 = scvt.s32.f32 %s1702_s0  ;;  %v40_v6 = vld [vmem:[%s1701_s2 + $0x90] sm:$0xff]  ;;  %936 = vmatprep.mubr.msk.f32.mxu1 %vm1236_vm0, %v1237_v8  ;;  %215 = vst [vmem:[#allocation2] sm:$0x1] %v1237_v8  ;;  %vm1238_vm2 = vmmov 1  }
   0x2   :  { %v22_v2 = vld [vmem:[%s1701_s2] sm:$0xff]  ;;  %v1079_v4 = vpack.c.bf16 %v39_v1, %v38_v0  ;;  %v23_v5 = vld [vmem:[%s1701_s2 + $0x8] sm:$0xff]  ;;  %v41_v7 = vld [vmem:[%s1701_s2 + $0x98] sm:$0xff]  ;;  %vm60_vm4 = vcmask 359424  }
   0x3   :  { %v1081_v9 = vpack.c.bf16 %v23_v5, %v22_v2  ;;  %v1083_v10 = vpack.c.bf16 %v41_v7, %v40_v6  ;;  %v24_v11 = vld [vmem:[%s1701_s2 + $0x10] sm:$0xff]  ;;  %v25_v12 = vld [vmem:[%s1701_s2 + $0x18] sm:$0xff]  ;;  %v42_v13 = vld [vmem:[%s1701_s2 + $0xa0] sm:$0xff]  ;;  %v230_v14 = vstv %s229_s26 }
   0x4   :  { %1080 = vmatprep.subr.bf16.mxu0 %v1079_v4  ;;  %v43_v15 = vld [vmem:[%s1701_s2 + $0xa8] sm:$0xff]  ;;  %1223 = vrcp.f32 %v230_v14  ;;  %v1085_v16 = vpack.c.bf16 %v25_v12, %v24_v11  ;;  %v26_v18 = vld [vmem:[%s1701_s2 + $0x20] sm:$0xff]  ;;  %v44_v20 = vld [vmem:[%s1701_s2 + $0xb0] sm:$0xff] }
   0x5   :  { %1082 = vmatpush3.bf16.msra.mxu0 %v1081_v9  ;;  %v1087_v17 = vpack.c.bf16 %v43_v15, %v42_v13  ;;  %v27_v19 = vld [vmem:[%s1701_s2 + $0x28] sm:$0xff]  ;;  %v45_v21 = vld [vmem:[%s1701_s2 + $0xb8] sm:$0xff]  ;;  %v54_v23 = vld [vmem:[%s1701_s2 + $0x100] sm:$0xff] }
   0x6   :  { %1084 = vmatprep.subr.bf16.mxu0 %v1083_v10  ;;  %v1089_v22 = vpack.c.bf16 %v27_v19, %v26_v18  ;;  %v55_v24 = vld [vmem:[%s1701_s2 + $0x108] sm:$0xff]  ;;  %v1091_v25 = vpack.c.bf16 %v45_v21, %v44_v20  ;;  %v28_v26 = vld [vmem:[%s1701_s2 + $0x30] sm:$0xff]  ;;  %v29_v27 = vld [vmem:[%s1701_s2 + $0x38] sm:$0xff] }
   0x7   :  { %v46_v28 = vld [vmem:[%s1701_s2 + $0xc0] sm:$0xff]  ;;  %v1112_v29 = vpack.c.bf16 %v55_v24, %v54_v23  ;;  %v47_v30 = vld [vmem:[%s1701_s2 + $0xc8] sm:$0xff]  ;;  %v56_v31 = vld [vmem:[%s1701_s2 + $0x110] sm:$0xff]  ;;  %v1093_v34 = vpack.c.bf16 %v29_v27, %v28_v26 }
   0x8   :  { %v57_v32 = vld [vmem:[%s1701_s2 + $0x118] sm:$0xff]  ;;  %v20_v35 = vld [vmem:[%s1703_s1 + $0x8] sm:$0xff]  ;;  %v58_v36 = vld [vmem:[%s1701_s2 + $0x120] sm:$0xff]  ;;  %v1095_v39 = vpack.c.bf16 %v47_v30, %v46_v28 }
   0x9   :  { %1086 = vmatpush3.bf16.msra.mxu0 %v1085_v16  ;;  %1113 = vmatpush3.bf16.msra.mxu1 %v1112_v29  ;;  %v1115_v33 = vpack.c.bf16 %v57_v32, %v56_v31  ;;  %v59_v37 = vld [vmem:[%s1701_s2 + $0x128] sm:$0xf]  ;;  %v30_v40 = vld [vmem:[%s1701_s2 + $0x40] sm:$0xff]  ;;  %v48_v42 = vld [vmem:[%s1701_s2 + $0xd0] sm:$0xff] }
   0xa   :  { %1088 = vmatprep.subr.bf16.mxu0 %v1087_v17  ;;  %1114 = vmatprep.subr.bf16.mxu1 %v1235_v3  ;;  %v31_v41 = vld [vmem:[%s1701_s2 + $0x48] sm:$0xff]  ;;  %v49_v43 = vld [vmem:[%s1701_s2 + $0xd8] sm:$0xff]  ;;  %v1118_v44 = vpack.c.bf16 %v59_v37, %v58_v36  ;;  %vm1119_vm3 = vmpackc.low %vm64_vm1, %vm1238_vm2 }
   0xb   :  { %132 = vmatprep.mubr.f32.mxu0 %v20_v35  ;;  %v1097_v45 = vpack.c.bf16 %v31_v41, %v30_v40  ;;  %v1099_v46 = vpack.c.bf16 %v49_v43, %v48_v42  ;;  %v32_v47 = vld [vmem:[%s1701_s2 + $0x50] sm:$0xff]  ;;  %v33_v48 = vld [vmem:[%s1701_s2 + $0x58] sm:$0xff]  ;;  %v50_v49 = vld [vmem:[%s1701_s2 + $0xe0] sm:$0xff]  ;;  %v235_v42 = vstv %s1702_s0 }
   0xc   :  { %v51_v50 = vld [vmem:[%s1701_s2 + $0xe8] sm:$0xff]  ;;  %v21_v51 = vld [vmem:[%s1703_s1 + $0x10] sm:$0xff]  ;;  %v1101_v52 = vpack.c.bf16 %v33_v48, %v32_v47  ;;  %v34_v54 = vld [vmem:[%s1701_s2 + $0x60] sm:$0xff] }
   0xd   :  { %1090 = vmatpush3.bf16.msra.mxu0 %v1089_v22  ;;  %1116 = vmatpush3.bf16.msra.mxu1 %v1115_v33  ;;  %v1103_v53 = vpack.c.bf16 %v51_v50, %v50_v49  ;;  %v35_v55 = vld [vmem:[%s1701_s2 + $0x68] sm:$0xff]  ;;  %v52_v56 = vld [vmem:[%s1701_s2 + $0xf0] sm:$0xff]  ;;  %v53_v57 = vld [vmem:[%s1701_s2 + $0xf8] sm:$0xff] }
   0xe   :  { %v1224_v38 = vpop.eup %1223  ;;  %1092 = vmatprep.subr.bf16.mxu0 %v1091_v25  ;;  %1117 = vmatprep.subr.bf16.mxu1 %v1235_v3  ;;  %v1105_v58 = vpack.c.bf16 %v35_v55, %v34_v54  ;;  %v1107_v59 = vpack.c.bf16 %v53_v57, %v52_v56  ;;  %v36_v60 = vld [vmem:[%s1701_s2 + $0x70] sm:$0xff]  ;;  %v37_v61 = vld [vmem:[%s1701_s2 + $0x78] sm:$0xff]  ;;  %v19_v63 = vld [vmem:[%s1703_s1] sm:$0xff] }
   0xf   :  { %1217 = vpush %v1224_v38  ;;  %v1109_v62 = vpack.c.bf16 %v37_v61, %v36_v60  ;;  %v274_v0 = vld [vmem:[%s1704_s3] sm:$0xff]  ;;  %v275_v1 = vld [vmem:[%s1704_s3 + $0x8] sm:$0xff]  ;;  %v276_v2 = vld [vmem:[%s1704_s3 + $0x10] sm:$0xff] }
  0x10   :  { %v1122_v4 = vpack.c.bf16 %v275_v1, %v274_v0  ;;  %v277_v5 = vld [vmem:[%s1704_s3 + $0x18] sm:$0xff]  ;;  %v278_v7 = vld [vmem:[%s1704_s3 + $0x20] sm:$0xff]  ;;  %v279_v9 = vld [vmem:[%s1704_s3 + $0x28] sm:$0xff] }
  0x11   :  { %1094 = vmatpush3.bf16.msra.mxu0 %v1093_v34  ;;  %1120 = vmatpush3.bf16.msk.msra.mxu1 %vm1119_vm3, %v1118_v44  ;;  %v1125_v6 = vpack.c.bf16 %v277_v5, %v276_v2  ;;  %v1128_v10 = vpack.c.bf16 %v279_v9, %v278_v7  ;;  %v280_v11 = vld [vmem:[%s1704_s3 + $0x30] sm:$0xff]  ;;  %v281_v12 = vld [vmem:[%s1704_s3 + $0x38] sm:$0xff]  ;;  %v282_v14 = vld [vmem:[%s1704_s3 + $0x40] sm:$0xff] }
  0x12   :  { %1096 = vmatprep.subr.bf16.mxu0 %v1095_v39  ;;  %1121 = vmatprep.subr.bf16.mxu1 %v1235_v3  ;;  %v1131_v13 = vpack.c.bf16 %v281_v12, %v280_v11  ;;  %v283_v15 = vld [vmem:[%s1704_s3 + $0x48] sm:$0xff]  ;;  %v284_v17 = vld [vmem:[%s1704_s3 + $0x50] sm:$0xff]  ;;  %v285_v18 = vld [vmem:[%s1704_s3 + $0x58] sm:$0xff]  ;;  %v233_v39 = vlaneseq }
  0x13   :  { %v1134_v16 = vpack.c.bf16 %v283_v15, %v282_v14  ;;  %v1137_v19 = vpack.c.bf16 %v285_v18, %v284_v17  ;;  %v286_v20 = vld [vmem:[%s1704_s3 + $0x60] sm:$0xff]  ;;  %v287_v21 = vld [vmem:[%s1704_s3 + $0x68] sm:$0xff]  ;;  %v288_v23 = vld [vmem:[%s1704_s3 + $0x70] sm:$0xff] }
  0x14   :  { %937 = vmatmul.mubr.msk.f32.vlgmr.msra.gmra.mrb[0].mxu1 %vm60_vm4, %v21_v51  ;;  %v1140_v22 = vpack.c.bf16 %v287_v21, %v286_v20  ;;  %v289_v24 = vld [vmem:[%s1704_s3 + $0x78] sm:$0xff]  ;;  %v216_v37 = vld [vmem:[#allocation2] sm:$0x1]  ;;  %v234_v41 = vshrl.u32 %v233_v39, 7  ;;  %v761_v0 = vld [vmem:[%s1705_s4 + $0x5] ss:$0 sm:$0xff] }
  0x15   :  { %1098 = vmatpush3.bf16.msra.mxu0 %v1097_v45  ;;  %971 = vmatprep.mubr.msk.f32.mxu1 %vm1236_vm0, %v1237_v8  ;;  %v1143_v25 = vpack.c.bf16 %v289_v24, %v288_v23  ;;  %v259_v60 = vld [vmem:[%s1705_s4] sm:$0x1]  ;;  %v764_v5 = vld [vmem:[%s1704_s3 + $0x88] sm:$0xff]  ;;  %v765_v7 = vld [vmem:[%s1704_s3 + $0x90] sm:$0xff] }
  0x16   :  { %1100 = vmatprep.subr.bf16.mxu0 %v1099_v46  ;;  %1123 = vmatpush3.bf16.msra.mxu1 %v1122_v4  ;;  %v1468_v44 = vsub.s32 0, %v234_v41  ;;  %vm236_vm5 = vcmp.lt.s32.totalorder %v234_v41, %v235_v42  ;;  %v763_v4 = vld [vmem:[%s1704_s3 + $0x80] sm:$0xff]  ;;  %v766_v9 = vld [vmem:[%s1704_s3 + $0x98] sm:$0xff]  ;;  %v768_v12 = vld [vmem:[%s1704_s3 + $0xa8] sm:$0xff] }
  0x17   :  { %1124 = vmatprep.subr.bf16.mxu1 %v1235_v3  ;;  %v1473_v48 = vsel %vm236_vm5, 1.0, %v1237_v8  ;;  %v767_v11 = vld [vmem:[%s1704_s3 + $0xa0] sm:$0xff]  ;;  %v769_v14 = vld [vmem:[%s1704_s3 + $0xb0] sm:$0xff]  ;;  %v770_v15 = vld [vmem:[%s1704_s3 + $0xb8] sm:$0xff] }
  0x18   :  { %v771_v17 = vld [vmem:[%s1704_s3 + $0xc0] sm:$0xff]  ;;  %v772_v18 = vld [vmem:[%s1704_s3 + $0xc8] sm:$0xff]  ;;  %v773_v20 = vld [vmem:[%s1704_s3 + $0xd0] sm:$0xff] }
  0x19   :  { %1102 = vmatpush3.bf16.msra.mxu0 %v1101_v52  ;;  %v774_v21 = vld [vmem:[%s1704_s3 + $0xd8] sm:$0xff]  ;;  %v775_v23 = vld [vmem:[%s1704_s3 + $0xe0] sm:$0xff]  ;;  %v776_v24 = vld [vmem:[%s1704_s3 + $0xe8] sm:$0xff] }
  0x1a   :  { %1104 = vmatprep.subr.bf16.mxu0 %v1103_v53  ;;  %1126 = vmatpush3.bf16.msra.mxu1 %v1125_v6  ;;  %v1146_v6 = vpack.c.bf16 %v764_v5, %v763_v4  ;;  %v786_v5 = vld [vmem:[%s1704_s3 + $0x130] sm:$0xff] }
  0x1b   :  { %1127 = vmatprep.subr.bf16.mxu1 %v1235_v3 }
  0x1d   :  { %1106 = vmatpush3.bf16.msra.mxu0 %v1105_v58 }
  0x1e   :  { %1108 = vmatprep.subr.bf16.mxu0 %v1107_v59  ;;  %1129 = vmatpush3.bf16.msra.mxu1 %v1128_v10  ;;  %v1149_v10 = vpack.c.bf16 %v766_v9, %v765_v7  ;;  %v788_v9 = vld [vmem:[%s1704_s3 + $0x140] sm:$0xff] }
  0x1f   :  { %1130 = vmatprep.subr.bf16.mxu1 %v1235_v3 }
  0x21   :  { %1110 = vmatpush3.bf16.msra.mxu0 %v1109_v62 }
  0x22   :  { %1145 = vmatprep.subr.bf16.mxu0 %v1235_v3  ;;  %1132 = vmatpush3.bf16.msra.mxu1 %v1131_v13  ;;  %v1152_v13 = vpack.c.bf16 %v768_v12, %v767_v11  ;;  %v790_v12 = vld [vmem:[%s1704_s3 + $0x150] sm:$0xff] }
  0x23   :  { %1133 = vmatprep.subr.bf16.mxu1 %v1235_v3 }
  0x24   :  { %133 = vmatmul.mubr.f32.vlgmr.msra.gmra.mrb[0].mxu0 %v19_v63 }
  0x25   :  { %1006 = vmatprep.mubr.msk.f32.mxu0 %vm1236_vm0, %v1237_v8  ;;  %1147 = vmatpush3.bf16.msra.mxu0 %v1146_v6  ;;  %v787_v6 = vld [vmem:[%s1704_s3 + $0x138] sm:$0xff] }
  0x26   :  { %1135 = vmatpush3.bf16.msra.mxu1 %v1134_v16  ;;  %1148 = vmatprep.subr.bf16.mxu0 %v1235_v3  ;;  %v1155_v16 = vpack.c.bf16 %v770_v15, %v769_v14  ;;  %v1179_v7 = vpack.c.bf16 %v787_v6, %v786_v5  ;;  %v792_v15 = vld [vmem:[%s1704_s3 + $0x160] sm:$0xff] }
  0x27   :  { %1136 = vmatprep.subr.bf16.mxu1 %v1235_v3  ;;  %v809_v6 = vld [vmem:[%s1704_s3 + $0x1e0] sm:$0xff] }
  0x29   :  { %1150 = vmatpush3.bf16.msra.mxu0 %v1149_v10  ;;  %v789_v10 = vld [vmem:[%s1704_s3 + $0x148] sm:$0xff] }
  0x2a   :  { %1138 = vmatpush3.bf16.msra.mxu1 %v1137_v19  ;;  %1151 = vmatprep.subr.bf16.mxu0 %v1235_v3  ;;  %v1158_v19 = vpack.c.bf16 %v772_v18, %v771_v17  ;;  %v1182_v11 = vpack.c.bf16 %v789_v10, %v788_v9  ;;  %v794_v18 = vld [vmem:[%s1704_s3 + $0x170] sm:$0xff] }
  0x2b   :  { %1139 = vmatprep.subr.bf16.mxu1 %v1235_v3  ;;  %v811_v10 = vld [vmem:[%s1704_s3 + $0x1f0] sm:$0xff] }
  0x2d   :  { %1153 = vmatpush3.bf16.msra.mxu0 %v1152_v13  ;;  %v791_v13 = vld [vmem:[%s1704_s3 + $0x158] sm:$0xff] }
  0x2e   :  { %1141 = vmatpush3.bf16.msra.mxu1 %v1140_v22  ;;  %1154 = vmatprep.subr.bf16.mxu0 %v1235_v3  ;;  %v1161_v22 = vpack.c.bf16 %v774_v21, %v773_v20  ;;  %v1185_v14 = vpack.c.bf16 %v791_v13, %v790_v12 }
  0x2f   :  { %1142 = vmatprep.subr.bf16.mxu1 %v1235_v3 }
  0x31   :  { %1156 = vmatpush3.bf16.msra.mxu0 %v1155_v16  ;;  %v793_v16 = vld [vmem:[%s1704_s3 + $0x168] sm:$0xff] }
  0x32   :  { %1144 = vmatpush3.bf16.msra.mxu1 %v1143_v25  ;;  %1157 = vmatprep.subr.bf16.mxu0 %v1235_v3  ;;  %v1164_v25 = vpack.c.bf16 %v776_v24, %v775_v23  ;;  %v1188_v17 = vpack.c.bf16 %v793_v16, %v792_v15 }
  0x33   :  { %1169 = vmatprep.subr.bf16.mxu1 %v1235_v3 }
  0x35   :  { %1159 = vmatpush3.bf16.msra.mxu0 %v1158_v19  ;;  %v795_v19 = vld [vmem:[%s1704_s3 + $0x178] sm:$0xff] }
  0x36   :  { %1160 = vmatprep.subr.bf16.mxu0 %v1235_v3  ;;  %v1191_v20 = vpack.c.bf16 %v795_v19, %v794_v18 }
  0x39   :  { %1162 = vmatpush3.bf16.msra.mxu0 %v1161_v22 }
  0x3a   :  { %1163 = vmatprep.subr.bf16.mxu0 %v1235_v3 }
  0x3d   :  { %1165 = vmatpush3.bf16.msra.mxu0 %v1164_v25 }
  0x3e   :  { %1166 = vmatprep.subr.bf16.mxu0 %v1235_v3 }
  0x40   :  { %s1218_s7 = spop %1217 }
  0x41   :  { %v1466_v43 = vstv %s1218_s7 }
  0xe7   :  { %v204_v26 = vpop.f32.mrb[0].mxu1 }
  0xe8   :  { %v938_v27 = vpop.f32.mrb[1].mxu1 }
  0xe9   :  { %v778_v27 = vld [vmem:[%s1704_s3 + $0xf8] sm:$0xff] }
  0xf7   :  { %v846_v28 = vpop.f32.mrb[0].mxu0 }
  0xf8   :  { %v847_v29 = vpop.f32.mrb[1].mxu0 }
  0xf9   :  { %v848_v30 = vadd.f32 %v847_v29, %v846_v28 }
  0xfb   :  { %v205_v31 = vadd.f32 %v848_v30, %v204_v26  ;;  %v777_v26 = vld [vmem:[%s1704_s3 + $0xf0] sm:$0xff] }
  0xfc   :  { %v1167_v28 = vpack.c.bf16 %v778_v27, %v777_v26 }
  0xfd   :  { %v217_v32 = vrot.slane %v205_v31, 4 }
  0xfe   :  { %1168 = vmatpush3.bf16.msra.mxu0 %v1167_v28 }
  0xff   :  { %v218_v33 = vadd.f32 %v217_v32, %v205_v31  ;;  %1193 = vmatprep.subr.bf16.mxu0 %v1235_v3 }
 0x101   :  { %v219_v34 = vrot.slane %v218_v33, 2 }
 0x103   :  { %v220_v35 = vadd.f32 %v219_v34, %v218_v33 }
 0x105   :  { %v221_v36 = vrot.slane %v220_v35, 1 }
 0x107   :  { %v222_v38 = vadd.f32 %v221_v36, %v220_v35 }
 0x109   :  { %v223_v40 = vadd.f32 %v222_v38, %v216_v37 }
 0x10b   :  { %224 = vst [vmem:[#allocation2] sm:$0x1] %v223_v40 }
 0x112   :  { %v240_v45 = vld [vmem:[#allocation2] sm:$0x1] }
 0x113   :  { %v242_v46 = vmul.f32 %v1466_v43, %v240_v45 }
 0x115   :  { %v247_v47 = vrot.slane %v242_v46, %v1468_v44 }
 0x117   :  { %v249_v49 = vsub.f32 %v205_v31, %v247_v47 }
 0x119   :  { %v250_v50 = vmul.f32 %v1473_v48, %v249_v49 }
 0x11b   :  { %v251_v51 = vmul.f32 %v250_v50, %v250_v50 }
 0x11d   :  { %v252_v52 = vrot.slane %v251_v51, 4 }
 0x11f   :  { %v253_v53 = vadd.f32 %v252_v52, %v251_v51 }
 0x121   :  { %v254_v54 = vrot.slane %v253_v53, 2 }
 0x123   :  { %v255_v55 = vadd.f32 %v254_v54, %v253_v53  ;;  %v378_v53 = vld [vmem:[%s1705_s4 + $0x1] sm:$0x1] }
 0x125   :  { %v256_v56 = vrot.slane %v255_v55, 1 }
 0x127   :  { %v257_v57 = vadd.f32 %v256_v56, %v255_v55 }
 0x129   :  { %v258_v58 = vmul.f32 %v257_v57, %v1466_v43  ;;  %v762_v57 = vld [vmem:[%s1705_s4 + $0x6] ss:$0 sm:$0xff] }
 0x12b   :  { %v260_v59 = vadd.f32 1e-05, %v258_v58 }
 0x12d   :  { %1225 = vrsqrt.f32 %v260_v59 }
 0x137   :  { %v1226_v61 = vpop.eup %1225 }
 0x138   :  { %v262_v62 = vmul.f32 %v1226_v61, %v259_v60  ;;  %v780_v60 = vld [vmem:[%s1704_s3 + $0x100] sm:$0xff]  ;;  %v781_v61 = vld [vmem:[%s1704_s3 + $0x108] sm:$0xff] }
 0x13a   :  { %v266_v63 = vrot.slane %v262_v62, %v1468_v44  ;;  %v1170_v62 = vpack.c.bf16 %v781_v61, %v780_v60  ;;  %v803_v61 = vld [vmem:[%s1704_s3 + $0x1b0] sm:$0xff] }
 0x13c   :  { %v267_v1 = vmul.f32 %v266_v63, %v250_v50  ;;  %v782_v63 = vld [vmem:[%s1704_s3 + $0x110] sm:$0xff] }
 0x13e   :  { %v273_v2 = vadd.f32 %v761_v0, %v267_v1  ;;  %v784_v1 = vld [vmem:[%s1704_s3 + $0x120] sm:$0xff] }
 0x140   :  { %972 = vmatmul.mubr.f32.vlgmr.msra.gmra.mrb[2].mxu1 %v273_v2  ;;  %v785_v2 = vld [vmem:[%s1704_s3 + $0x128] sm:$0xff] }
 0x141   :  { %1041 = vmatprep.mubr.msk.f32.mxu1 %vm1236_vm0, %v1237_v8  ;;  %1171 = vmatpush3.bf16.msra.mxu1 %v1170_v62  ;;  %v1176_v4 = vpack.c.bf16 %v785_v2, %v784_v1  ;;  %v804_v62 = vld [vmem:[%s1704_s3 + $0x1b8] sm:$0xff]  ;;  %v807_v2 = vld [vmem:[%s1704_s3 + $0x1d0] sm:$0xff] }
 0x142   :  { %1172 = vmatprep.subr.bf16.mxu1 %v1235_v3 }
 0x213   :  { %v356_v29 = vpop.f32.mrb[2].mxu1 }
 0x214   :  { %v360_v30 = vmul.f32 %v1473_v48, %v356_v29  ;;  %v973_v31 = vpop.f32.mrb[3].mxu1 }
 0x216   :  { %v361_v32 = vrot.slane %v360_v30, 4 }
 0x218   :  { %v362_v33 = vadd.f32 %v361_v32, %v360_v30 }
 0x21a   :  { %v363_v34 = vrot.slane %v362_v33, 2 }
 0x21c   :  { %v364_v35 = vadd.f32 %v363_v34, %v362_v33 }
 0x21e   :  { %v365_v36 = vrot.slane %v364_v35, 1 }
 0x220   :  { %v366_v37 = vadd.f32 %v365_v36, %v364_v35 }
 0x222   :  { %v367_v38 = vmul.f32 %v366_v37, %v1466_v43 }
 0x224   :  { %v368_v39 = vsub.f32 %v356_v29, %v367_v38 }
 0x226   :  { %v369_v40 = vmul.f32 %v1473_v48, %v368_v39 }
 0x228   :  { %v370_v41 = vmul.f32 %v369_v40, %v369_v40 }
 0x22a   :  { %v371_v42 = vrot.slane %v370_v41, 4 }
 0x22c   :  { %v372_v45 = vadd.f32 %v371_v42, %v370_v41  ;;  %v498_v42 = vld [vmem:[%s1705_s4 + $0x2] sm:$0x1] }
 0x22e   :  { %v373_v46 = vrot.slane %v372_v45, 2 }
 0x230   :  { %v374_v47 = vadd.f32 %v373_v46, %v372_v45 }
 0x232   :  { %v375_v49 = vrot.slane %v374_v47, 1 }
 0x234   :  { %v376_v50 = vadd.f32 %v375_v49, %v374_v47  ;;  %v779_v49 = vld [vmem:[%s1705_s4 + $0x7] ss:$0 sm:$0xff] }
 0x236   :  { %v377_v51 = vmul.f32 %v376_v50, %v1466_v43 }
 0x238   :  { %v379_v52 = vadd.f32 1e-05, %v377_v51 }
 0x23a   :  { %1227 = vrsqrt.f32 %v379_v52  ;;  %v797_v52 = vld [vmem:[%s1704_s3 + $0x180] sm:$0xff] }
 0x244   :  { %v1228_v54 = vpop.eup %1227 }
 0x245   :  { %v381_v55 = vmul.f32 %v1228_v54, %v378_v53  ;;  %v798_v53 = vld [vmem:[%s1704_s3 + $0x188] sm:$0xff] }
 0x246   :  { %v1194_v54 = vpack.c.bf16 %v798_v53, %v797_v52 }
 0x247   :  { %v385_v56 = vrot.slane %v381_v55, %v1468_v44  ;;  %v799_v55 = vld [vmem:[%s1704_s3 + $0x190] sm:$0xff] }
 0x249   :  { %v386_v58 = vmul.f32 %v385_v56, %v369_v40  ;;  %v800_v56 = vld [vmem:[%s1704_s3 + $0x198] sm:$0xff] }
 0x24b   :  { %v392_v59 = vadd.f32 %v762_v57, %v386_v58  ;;  %v1197_v57 = vpack.c.bf16 %v800_v56, %v799_v55  ;;  %v801_v58 = vld [vmem:[%s1704_s3 + $0x1a0] sm:$0xff] }
 0x24d   :  { %1007 = vmatmul.mubr.f32.vlgmr.msra.gmra.mrb[2].mxu0 %v392_v59  ;;  %v802_v59 = vld [vmem:[%s1704_s3 + $0x1a8] sm:$0xff] }
 0x24e   :  { %1076 = vmatprep.mubr.msk.f32.mxu0 %vm1236_vm0, %v1237_v8  ;;  %v783_v8 = vld [vmem:[%s1704_s3 + $0x118] sm:$0xff]  ;;  %1195 = vmatpush3.bf16.msra.mxu0 %v1194_v54  ;;  %v1200_v60 = vpack.c.bf16 %v802_v59, %v801_v58 }
 0x24f   :  { %v1173_v0 = vpack.c.bf16 %v783_v8, %v782_v63  ;;  %1196 = vmatprep.subr.bf16.mxu0 %v1235_v3  ;;  %v1203_v63 = vpack.c.bf16 %v804_v62, %v803_v61  ;;  %v805_v8 = vld [vmem:[%s1704_s3 + $0x1c0] sm:$0xff] }
 0x251   :  { %1174 = vmatpush3.bf16.msra.mxu1 %v1173_v0  ;;  %v806_v0 = vld [vmem:[%s1704_s3 + $0x1c8] sm:$0xff] }
 0x252   :  { %1175 = vmatprep.subr.bf16.mxu1 %v1235_v3  ;;  %1198 = vmatpush3.bf16.msra.mxu0 %v1197_v57  ;;  %v1206_v1 = vpack.c.bf16 %v806_v0, %v805_v8  ;;  %v738_v8 = vld [vmem:[%s1705_s4 + $0x4] sm:$0x1] }
 0x253   :  { %1199 = vmatprep.subr.bf16.mxu0 %v1235_v3 }
 0x255   :  { %1177 = vmatpush3.bf16.msra.mxu1 %v1176_v4  ;;  %v808_v4 = vld [vmem:[%s1704_s3 + $0x1d8] sm:$0xff] }
 0x256   :  { %1178 = vmatprep.subr.bf16.mxu1 %v1235_v3  ;;  %1201 = vmatpush3.bf16.msra.mxu0 %v1200_v60  ;;  %v1209_v5 = vpack.c.bf16 %v808_v4, %v807_v2 }
 0x257   :  { %1202 = vmatprep.subr.bf16.mxu0 %v1235_v3 }
 0x259   :  { %1180 = vmatpush3.bf16.msra.mxu1 %v1179_v7  ;;  %v810_v7 = vld [vmem:[%s1704_s3 + $0x1e8] sm:$0xff] }
 0x25a   :  { %1181 = vmatprep.subr.bf16.mxu1 %v1235_v3  ;;  %1204 = vmatpush3.bf16.msra.mxu0 %v1203_v63  ;;  %v1212_v9 = vpack.c.bf16 %v810_v7, %v809_v6 }
 0x25b   :  { %1205 = vmatprep.subr.bf16.mxu0 %v1235_v3 }
 0x25d   :  { %1183 = vmatpush3.bf16.msra.mxu1 %v1182_v11  ;;  %v812_v11 = vld [vmem:[%s1704_s3 + $0x1f8] sm:$0xff] }
 0x25e   :  { %1184 = vmatprep.subr.bf16.mxu1 %v1235_v3  ;;  %1207 = vmatpush3.bf16.msra.mxu0 %v1206_v1  ;;  %v1215_v12 = vpack.c.bf16 %v812_v11, %v811_v10 }
 0x25f   :  { %1208 = vmatprep.subr.bf16.mxu0 %v1235_v3 }
 0x261   :  { %1186 = vmatpush3.bf16.msra.mxu1 %v1185_v14 }
 0x262   :  { %1187 = vmatprep.subr.bf16.mxu1 %v1235_v3  ;;  %1210 = vmatpush3.bf16.msra.mxu0 %v1209_v5 }
 0x263   :  { %1211 = vmatprep.subr.bf16.mxu0 %v1235_v3 }
 0x265   :  { %1189 = vmatpush3.bf16.msra.mxu1 %v1188_v17 }
 0x266   :  { %1190 = vmatprep.subr.bf16.mxu1 %v1235_v3  ;;  %1213 = vmatpush3.bf16.msra.mxu0 %v1212_v9 }
 0x267   :  { %1214 = vmatprep.subr.bf16.mxu0 %v1235_v3 }
 0x269   :  { %1192 = vmatpush3.bf16.msra.mxu1 %v1191_v20 }
 0x26a   :  { %1216 = vmatpush3.bf16.msra.mxu0 %v1215_v12 }
 0x320   :  { %v476_v21 = vpop.f32.mrb[2].mxu0 }
 0x321   :  { %v480_v22 = vmul.f32 %v1473_v48, %v476_v21  ;;  %v1008_v23 = vpop.f32.mrb[3].mxu0 }
 0x323   :  { %v481_v24 = vrot.slane %v480_v22, 4 }
 0x325   :  { %v482_v25 = vadd.f32 %v481_v24, %v480_v22 }
 0x327   :  { %v483_v26 = vrot.slane %v482_v25, 2 }
 0x329   :  { %v484_v27 = vadd.f32 %v483_v26, %v482_v25 }
 0x32b   :  { %v485_v28 = vrot.slane %v484_v27, 1 }
 0x32d   :  { %v486_v29 = vadd.f32 %v485_v28, %v484_v27 }
 0x32f   :  { %v487_v30 = vmul.f32 %v486_v29, %v1466_v43 }
 0x331   :  { %v488_v31 = vsub.f32 %v476_v21, %v487_v30 }
 0x333   :  { %v489_v32 = vmul.f32 %v1473_v48, %v488_v31 }
 0x335   :  { %v490_v33 = vmul.f32 %v489_v32, %v489_v32 }
 0x337   :  { %v491_v34 = vrot.slane %v490_v33, 4 }
 0x339   :  { %v492_v35 = vadd.f32 %v491_v34, %v490_v33  ;;  %v618_v33 = vld [vmem:[%s1705_s4 + $0x3] sm:$0x1] }
 0x33b   :  { %v493_v36 = vrot.slane %v492_v35, 2 }
 0x33d   :  { %v494_v37 = vadd.f32 %v493_v36, %v492_v35 }
 0x33f   :  { %v495_v38 = vrot.slane %v494_v37, 1 }
 0x341   :  { %v496_v39 = vadd.f32 %v495_v38, %v494_v37  ;;  %v796_v37 = vld [vmem:[%s1705_s4 + $0x8] ss:$0 sm:$0xff] }
 0x343   :  { %v497_v40 = vmul.f32 %v496_v39, %v1466_v43 }
 0x345   :  { %v499_v41 = vadd.f32 1e-05, %v497_v40 }
 0x347   :  { %1229 = vrsqrt.f32 %v499_v41 }
 0x351   :  { %v1230_v45 = vpop.eup %1229 }
 0x352   :  { %v501_v46 = vmul.f32 %v1230_v45, %v498_v42 }
 0x354   :  { %v505_v47 = vrot.slane %v501_v46, %v1468_v44 }
 0x356   :  { %v506_v50 = vmul.f32 %v505_v47, %v489_v32 }
 0x358   :  { %v512_v51 = vadd.f32 %v779_v49, %v506_v50 }
 0x35a   :  { %1042 = vmatmul.mubr.f32.vlgmr.msra.gmra.mrb[4].mxu1 %v512_v51 }
 0x42d   :  { %v596_v13 = vpop.f32.mrb[4].mxu1 }
 0x42e   :  { %v600_v14 = vmul.f32 %v1473_v48, %v596_v13  ;;  %v1043_v15 = vpop.f32.mrb[5].mxu1 }
 0x430   :  { %v601_v16 = vrot.slane %v600_v14, 4 }
 0x432   :  { %v602_v17 = vadd.f32 %v601_v16, %v600_v14 }
 0x434   :  { %v603_v18 = vrot.slane %v602_v17, 2 }
 0x436   :  { %v604_v19 = vadd.f32 %v603_v18, %v602_v17 }
 0x438   :  { %v605_v20 = vrot.slane %v604_v19, 1 }
 0x43a   :  { %v606_v3 = vadd.f32 %v605_v20, %v604_v19 }
 0x43c   :  { %v607_v21 = vmul.f32 %v606_v3, %v1466_v43 }
 0x43e   :  { %v608_v22 = vsub.f32 %v596_v13, %v607_v21 }
 0x440   :  { %v609_v23 = vmul.f32 %v1473_v48, %v608_v22 }
 0x442   :  { %v610_v24 = vmul.f32 %v609_v23, %v609_v23 }
 0x444   :  { %v611_v25 = vrot.slane %v610_v24, 4 }
 0x446   :  { %v612_v26 = vadd.f32 %v611_v25, %v610_v24 }
 0x448   :  { %v613_v27 = vrot.slane %v612_v26, 2 }
 0x44a   :  { %v614_v28 = vadd.f32 %v613_v27, %v612_v26 }
 0x44c   :  { %v615_v29 = vrot.slane %v614_v28, 1 }
 0x44e   :  { %v616_v30 = vadd.f32 %v615_v29, %v614_v28 }
 0x450   :  { %v617_v31 = vmul.f32 %v616_v30, %v1466_v43 }
 0x452   :  { %v619_v32 = vadd.f32 1e-05, %v617_v31 }
 0x454   :  { %1231 = vrsqrt.f32 %v619_v32 }
 0x45e   :  { %v1232_v34 = vpop.eup %1231 }
 0x45f   :  { %v621_v35 = vmul.f32 %v1232_v34, %v618_v33 }
 0x461   :  { %v625_v36 = vrot.slane %v621_v35, %v1468_v44 }
 0x463   :  { %v626_v38 = vmul.f32 %v625_v36, %v609_v23 }
 0x465   :  { %v632_v39 = vadd.f32 %v796_v37, %v626_v38 }
 0x467   :  { %1077 = vmatmul.mubr.f32.vlgmr.msra.gmra.mrb[4].mxu0 %v632_v39 }
 0x53a   :  { %v716_v40 = vpop.f32.mrb[4].mxu0 }
 0x53b   :  { %v720_v41 = vmul.f32 %v1473_v48, %v716_v40  ;;  %v1078_v42 = vpop.f32.mrb[5].mxu0 }
 0x53d   :  { %v721_v45 = vrot.slane %v720_v41, 4 }
 0x53f   :  { %v722_v46 = vadd.f32 %v721_v45, %v720_v41 }
 0x541   :  { %v723_v47 = vrot.slane %v722_v46, 2 }
 0x543   :  { %v724_v49 = vadd.f32 %v723_v47, %v722_v46 }
 0x545   :  { %v725_v50 = vrot.slane %v724_v49, 1 }
 0x547   :  { %v726_v51 = vadd.f32 %v725_v50, %v724_v49 }
 0x549   :  { %v727_v52 = vmul.f32 %v726_v51, %v1466_v43 }
 0x54b   :  { %v728_v53 = vsub.f32 %v716_v40, %v727_v52 }
 0x54d   :  { %v729_v54 = vmul.f32 %v1473_v48, %v728_v53  ;;  %v813_v48 = vld [vmem:[%s1705_s4 + $0x9] ss:$0 sm:$0xff] }
 0x54f   :  { %v730_v55 = vmul.f32 %v729_v54, %v729_v54 }
 0x551   :  { %v731_v56 = vrot.slane %v730_v55, 4 }
 0x553   :  { %v732_v57 = vadd.f32 %v731_v56, %v730_v55 }
 0x555   :  { %v733_v58 = vrot.slane %v732_v57, 2 }
 0x557   :  { %v734_v59 = vadd.f32 %v733_v58, %v732_v57 }
 0x559   :  { %v735_v60 = vrot.slane %v734_v59, 1 }
 0x55b   :  { %v736_v61 = vadd.f32 %v735_v60, %v734_v59 }
 0x55d   :  { %v737_v62 = vmul.f32 %v736_v61, %v1466_v43 }
 0x55f   :  { %v739_v63 = vadd.f32 1e-05, %v737_v62 }
 0x561   :  { %1233 = vrsqrt.f32 %v739_v63 }
 0x56b   :  { %v1234_v0 = vpop.eup %1233 }
 0x56c   :  { %v741_v1 = vmul.f32 %v1234_v0, %v738_v8 }
 0x56e   :  { %v745_v2 = vrot.slane %v741_v1, %v1468_v44 }
 0x570   :  { %v746_v4 = vmul.f32 %v745_v2, %v729_v54 }
 0x572   :  { %v752_v5 = vadd.f32 %v813_v48, %v746_v4 }
 0x574   :  { %753 = vst [vmem:[%s1706_s5] sm:$0xff] %v752_v5 }

</bundles_post_ra>
